<compile_context>
chip_gen: v6e
topology: v6e:2x2x1
jax: 0.10.0
libtpu: 0.0.40
codegen_flags: <defaults>
</compile_context>

<pallas_src>
import functools
import math

import jax
import jax.numpy as jnp
from jax import lax
from jax.experimental import pallas as pl
from jax.experimental.pallas import tpu as pltpu  # noqa: F401  (TPU backend)


# ------------------------------ Pallas kernel -------------------------------

def mha_kernel(emb_ref, wqkv_ref, bqkv_ref, wl_ref, bl_ref, o_ref,
               *, batch, seq, num_heads):
    """Fused QKV projection + multi-head attention + output projection.

    emb_ref : (B*S, D)   f32   all batch elements, flattened over batch*seq
    wqkv_ref: (D, 3D)    bf16  [wq*scaling | wk | wv]   (in, out) layout
    bqkv_ref: (1, 3D)    f32   [bq*scaling | bk | bv]
    wl_ref  : (D, out)   bf16
    bl_ref  : (1, out)   f32
    o_ref   : (B*S, out) f32
    """
    D = wl_ref.shape[0]
    dh = D // num_heads

    xb = emb_ref[...].astype(jnp.bfloat16)                       # (B*S, D)
    # One fused QKV matmul (MXU, f32 accumulate); scaling already folded in.
    qkv = jnp.dot(xb, wqkv_ref[...],
                  preferred_element_type=jnp.float32) + bqkv_ref[...]

    outs = []
    for b in range(batch):                                       # static unroll (B=2)
        q_b = qkv[b * seq:(b + 1) * seq, 0 * D:1 * D]            # (S, D) pre-scaled
        k_b = qkv[b * seq:(b + 1) * seq, 1 * D:2 * D]
        v_b = qkv[b * seq:(b + 1) * seq, 2 * D:3 * D]

        out_b = None
        for h in range(num_heads):                               # static unroll (H=4)
            qh = q_b[:, h * dh:(h + 1) * dh].astype(jnp.bfloat16)
            kh = k_b[:, h * dh:(h + 1) * dh].astype(jnp.bfloat16)
            vh = v_b[:, h * dh:(h + 1) * dh].astype(jnp.bfloat16)

            # scores = qh @ kh.T (contract last dims; no XLU transpose)
            scores = lax.dot_general(qh, kh, (((1,), (1,)), ((), ())),
                                     preferred_element_type=jnp.float32)
            scores = scores - jnp.max(scores, axis=-1, keepdims=True)
            p = jnp.exp(scores)                                  # f32
            # Deferred normalization: scale (S, dh) context instead of (S, S) p,
            # with the reciprocal on the (otherwise idle) EUP.
            inv = pl.reciprocal(jnp.sum(p, axis=-1, keepdims=True), approx=True)
            # att_drop is identity at inference.
            ctx_h = jnp.dot(p.astype(jnp.bfloat16), vh,
                            preferred_element_type=jnp.float32) * inv
            # Accumulate the output projection per head (no lane concat).
            contrib = jnp.dot(ctx_h.astype(jnp.bfloat16),
                              wl_ref[h * dh:(h + 1) * dh, :],
                              preferred_element_type=jnp.float32)
            out_b = contrib if out_b is None else out_b + contrib
        outs.append(out_b)

    out = jnp.concatenate(outs, axis=0) + bl_ref[...]            # sublane-aligned stack
    o_ref[...] = out.astype(o_ref.dtype)                         # single store


# ------------------------------- wrapper -------------------------------------

def layout_attention(emb, packed, *, num_heads):
    """emb: (B, S, D) f32; packed: pre-folded / pre-cast parameters."""
    B, S, D = emb.shape
    out_dim = packed["wl"].shape[1]

    kernel = functools.partial(mha_kernel, batch=B, seq=S, num_heads=num_heads)

    out2d = pl.pallas_call(
        kernel,
        out_shape=jax.ShapeDtypeStruct((B * S, out_dim), jnp.float32),
    )(emb.reshape(B * S, D),
      packed["wqkv"], packed["bqkv"], packed["wl"], packed["bl"])

    return out2d.reshape(B, S, out_dim)


def pack_params(params, *, num_heads):
    """Fold the attention scaling into wq/bq, fuse QKV weights, pre-cast to bf16.

    Runs once at parameter-prep time (outside the jitted forward).
    """
    emb_dim = params["wq"].shape[0]
    assert emb_dim % num_heads == 0
    scaling = (emb_dim // num_heads) ** (-0.5)

    wqkv = jnp.concatenate(
        [params["wq"] * scaling, params["wk"], params["wv"]], axis=1)   # (D, 3D)
    bqkv = jnp.concatenate(
        [params["bq"] * scaling, params["bk"], params["bv"]], axis=1)   # (1, 3D)

    return dict(
        wqkv=wqkv.astype(jnp.bfloat16),
        bqkv=bqkv.astype(jnp.float32),
        wl=params["wl"].astype(jnp.bfloat16),
        bl=params["bl"].astype(jnp.float32),
    )


# --------------------------- pure-JAX reference ------------------------------

def layout_attention_ref(emb, params, *, num_heads):
    B, S, D = emb.shape
    dh = D // num_heads
    scaling = (D // num_heads) ** (-0.5)

    def lin(x, w, b):
        return jnp.einsum("bsd,df->bsf", x, w) + b

    q = lin(emb, params["wq"], params["bq"]).reshape(B, S, num_heads, dh).transpose(0, 2, 1, 3)
    k = lin(emb, params["wk"], params["bk"]).reshape(B, S, num_heads, dh).transpose(0, 2, 1, 3)
    v = lin(emb, params["wv"], params["bv"]).reshape(B, S, num_heads, dh).transpose(0, 2, 1, 3)
    w = jnp.einsum("bhqd,bhkd->bhqk", q, k) * scaling
    a = jax.nn.softmax(w, axis=-1)
    ctx = jnp.einsum("bhqk,bhkd->bhqd", a, v).transpose(0, 2, 1, 3).reshape(B, S, D)
    return jnp.einsum("bsd,df->bsf", ctx, params["wl"]) + params["bl"]


# ------------------------------ parameters -----------------------------------

def init_params(key, emb_dim, out_dim):
    """nn.Linear-style init: U(-1/sqrt(fan_in), 1/sqrt(fan_in)) for W and b."""
    def linear(k, fan_in, fan_out):
        kw, kb = jax.random.split(k)
        bound = 1.0 / math.sqrt(fan_in)
        w = jax.random.uniform(kw, (fan_in, fan_out), jnp.float32, -bound, bound)
        b = jax.random.uniform(kb, (1, fan_out), jnp.float32, -bound, bound)
        return w, b

    kq, kk, kv, kl = jax.random.split(key, 4)
    wq, bq = linear(kq, emb_dim, emb_dim)
    wk, bk = linear(kk, emb_dim, emb_dim)
    wv, bv = linear(kv, emb_dim, emb_dim)
    wl, bl = linear(kl, emb_dim, out_dim)
    return dict(wq=wq, bq=bq, wk=wk, bk=bk, wv=wv, bv=bv, wl=wl, bl=bl)


# --------------------------------- main ---------------------------------------

if __name__ == "__main__":
    B, S, EMB_DIM, NUM_HEADS, OUT_DIM = 2, 8, 64, 4, 32

    key = jax.random.PRNGKey(0)
    key, k_emb, k_par = jax.random.split(key, 3)

    # Stand-in for ImageEmbedding output: per box, 4 normalized coords + 60
    # sigmoid outputs, all in [0, 1].
    emb = jax.random.uniform(k_emb, (B, S, EMB_DIM), jnp.float32)
    params = init_params(k_par, EMB_DIM, OUT_DIM)
    packed = pack_params(params, num_heads=NUM_HEADS)   # one-time fold / cast

    fwd = jax.jit(functools.partial(layout_attention, num_heads=NUM_HEADS))
    y = fwd(emb, packed)
    jax.block_until_ready(y)

    assert y.shape == (B, S, OUT_DIM), y.shape
    assert bool(jnp.all(jnp.isfinite(y)))

    y_ref = layout_attention_ref(emb, params, num_heads=NUM_HEADS)
    max_err = float(jnp.max(jnp.abs(y - y_ref)))
    assert max_err < 3e-2, max_err  # bf16 matmul operands + approx reciprocal

    print("KERNEL_OK")
</pallas_src>

<mosaic_0001>
module attributes {stable_mosaic.version = 11 : i64} {
  func.func @mha_kernel(%arg0: memref<16x64xf32, #tpu.memory_space<vmem>>, %arg1: memref<64x192xbf16, #tpu.memory_space<vmem>>, %arg2: memref<1x192xf32, #tpu.memory_space<vmem>>, %arg3: memref<64x32xbf16, #tpu.memory_space<vmem>>, %arg4: memref<1x32xf32, #tpu.memory_space<vmem>>, %arg5: memref<16x32xf32, #tpu.memory_space<vmem>>) attributes {dimension_semantics = [], scalar_prefetch = 0 : i64, scratch_operands = 0 : i64, tpu.core_type = #tpu.core_type<tc>} {
    %c0 = arith.constant 0 : index
    %c0_0 = arith.constant 0 : index
    %0 = vector.load %arg0[%c0, %c0_0] : memref<16x64xf32, #tpu.memory_space<vmem>>, vector<16x64xf32>
    %1 = arith.truncf %0 : vector<16x64xf32> to vector<16x64xbf16>
    %c0_1 = arith.constant 0 : index
    %c0_2 = arith.constant 0 : index
    %2 = vector.load %arg1[%c0_1, %c0_2] : memref<64x192xbf16, #tpu.memory_space<vmem>>, vector<64x192xbf16>
    %cst = arith.constant dense<0.000000e+00> : vector<16x192xf32>
    %3 = tpu.matmul %1, %2, %cst {dimension_numbers = #tpu.dot_dimension_numbers<[1], [0], [0], [1], [0, 0, 1, 1], [], []>} : vector<16x64xbf16>, vector<64x192xbf16>, vector<16x192xf32> -> vector<16x192xf32>
    %c0_3 = arith.constant 0 : index
    %c0_4 = arith.constant 0 : index
    %4 = vector.load %arg2[%c0_3, %c0_4] : memref<1x192xf32, #tpu.memory_space<vmem>>, vector<1x192xf32>
    %5 = vector.broadcast %4 : vector<1x192xf32> to vector<16x192xf32>
    %6 = arith.addf %3, %5 : vector<16x192xf32>
    %7 = vector.extract_strided_slice %6 {offsets = [0, 0], sizes = [8, 64], strides = [1, 1]} : vector<16x192xf32> to vector<8x64xf32>
    %8 = vector.extract_strided_slice %6 {offsets = [0, 64], sizes = [8, 64], strides = [1, 1]} : vector<16x192xf32> to vector<8x64xf32>
    %9 = vector.extract_strided_slice %6 {offsets = [0, 128], sizes = [8, 64], strides = [1, 1]} : vector<16x192xf32> to vector<8x64xf32>
    %10 = vector.extract_strided_slice %7 {offsets = [0, 0], sizes = [8, 16], strides = [1, 1]} : vector<8x64xf32> to vector<8x16xf32>
    %11 = arith.truncf %10 : vector<8x16xf32> to vector<8x16xbf16>
    %12 = vector.extract_strided_slice %8 {offsets = [0, 0], sizes = [8, 16], strides = [1, 1]} : vector<8x64xf32> to vector<8x16xf32>
    %13 = arith.truncf %12 : vector<8x16xf32> to vector<8x16xbf16>
    %14 = vector.extract_strided_slice %9 {offsets = [0, 0], sizes = [8, 16], strides = [1, 1]} : vector<8x64xf32> to vector<8x16xf32>
    %15 = arith.truncf %14 : vector<8x16xf32> to vector<8x16xbf16>
    %cst_5 = arith.constant dense<0.000000e+00> : vector<8x8xf32>
    %16 = tpu.matmul %11, %13, %cst_5 {dimension_numbers = #tpu.dot_dimension_numbers<[1], [1], [0], [0], [0, 0, 1, 0], [], []>} : vector<8x16xbf16>, vector<8x16xbf16>, vector<8x8xf32> -> vector<8x8xf32>
    %cst_6 = arith.constant dense<0xFF800000> : vector<8xf32>
    %17 = vector.multi_reduction <maximumf>, %16, %cst_6 [1] : vector<8x8xf32> to vector<8xf32>
    %18 = vector.shape_cast %17 : vector<8xf32> to vector<8x1xf32>
    %19 = vector.broadcast %18 : vector<8x1xf32> to vector<8x8xf32>
    %20 = arith.subf %16, %19 : vector<8x8xf32>
    %21 = math.exp %20 : vector<8x8xf32>
    %cst_7 = arith.constant dense<0.000000e+00> : vector<8xf32>
    %22 = vector.multi_reduction <add>, %21, %cst_7 [1] : vector<8x8xf32> to vector<8xf32>
    %23 = vector.shape_cast %22 : vector<8xf32> to vector<8x1xf32>
    %24 = tpu.reciprocal %23 {approx = true} : vector<8x1xf32> -> vector<8x1xf32>
    %25 = arith.truncf %21 : vector<8x8xf32> to vector<8x8xbf16>
    %cst_8 = arith.constant dense<0.000000e+00> : vector<8x16xf32>
    %26 = tpu.matmul %25, %15, %cst_8 {dimension_numbers = #tpu.dot_dimension_numbers<[1], [0], [0], [1], [0, 0, 1, 1], [], []>} : vector<8x8xbf16>, vector<8x16xbf16>, vector<8x16xf32> -> vector<8x16xf32>
    %27 = vector.broadcast %24 : vector<8x1xf32> to vector<8x16xf32>
    %28 = arith.mulf %26, %27 : vector<8x16xf32>
    %29 = arith.truncf %28 : vector<8x16xf32> to vector<8x16xbf16>
    %c0_9 = arith.constant 0 : index
    %c0_10 = arith.constant 0 : index
    %30 = vector.load %arg3[%c0_9, %c0_10] : memref<64x32xbf16, #tpu.memory_space<vmem>>, vector<16x32xbf16>
    %cst_11 = arith.constant dense<0.000000e+00> : vector<8x32xf32>
    %31 = tpu.matmul %29, %30, %cst_11 {dimension_numbers = #tpu.dot_dimension_numbers<[1], [0], [0], [1], [0, 0, 1, 1], [], []>} : vector<8x16xbf16>, vector<16x32xbf16>, vector<8x32xf32> -> vector<8x32xf32>
    %32 = vector.extract_strided_slice %7 {offsets = [0, 16], sizes = [8, 16], strides = [1, 1]} : vector<8x64xf32> to vector<8x16xf32>
    %33 = arith.truncf %32 : vector<8x16xf32> to vector<8x16xbf16>
    %34 = vector.extract_strided_slice %8 {offsets = [0, 16], sizes = [8, 16], strides = [1, 1]} : vector<8x64xf32> to vector<8x16xf32>
    %35 = arith.truncf %34 : vector<8x16xf32> to vector<8x16xbf16>
    %36 = vector.extract_strided_slice %9 {offsets = [0, 16], sizes = [8, 16], strides = [1, 1]} : vector<8x64xf32> to vector<8x16xf32>
    %37 = arith.truncf %36 : vector<8x16xf32> to vector<8x16xbf16>
    %cst_12 = arith.constant dense<0.000000e+00> : vector<8x8xf32>
    %38 = tpu.matmul %33, %35, %cst_12 {dimension_numbers = #tpu.dot_dimension_numbers<[1], [1], [0], [0], [0, 0, 1, 0], [], []>} : vector<8x16xbf16>, vector<8x16xbf16>, vector<8x8xf32> -> vector<8x8xf32>
    %cst_13 = arith.constant dense<0xFF800000> : vector<8xf32>
    %39 = vector.multi_reduction <maximumf>, %38, %cst_13 [1] : vector<8x8xf32> to vector<8xf32>
    %40 = vector.shape_cast %39 : vector<8xf32> to vector<8x1xf32>
    %41 = vector.broadcast %40 : vector<8x1xf32> to vector<8x8xf32>
    %42 = arith.subf %38, %41 : vector<8x8xf32>
    %43 = math.exp %42 : vector<8x8xf32>
    %cst_14 = arith.constant dense<0.000000e+00> : vector<8xf32>
    %44 = vector.multi_reduction <add>, %43, %cst_14 [1] : vector<8x8xf32> to vector<8xf32>
    %45 = vector.shape_cast %44 : vector<8xf32> to vector<8x1xf32>
    %46 = tpu.reciprocal %45 {approx = true} : vector<8x1xf32> -> vector<8x1xf32>
    %47 = arith.truncf %43 : vector<8x8xf32> to vector<8x8xbf16>
    %cst_15 = arith.constant dense<0.000000e+00> : vector<8x16xf32>
    %48 = tpu.matmul %47, %37, %cst_15 {dimension_numbers = #tpu.dot_dimension_numbers<[1], [0], [0], [1], [0, 0, 1, 1], [], []>} : vector<8x8xbf16>, vector<8x16xbf16>, vector<8x16xf32> -> vector<8x16xf32>
    %49 = vector.broadcast %46 : vector<8x1xf32> to vector<8x16xf32>
    %50 = arith.mulf %48, %49 : vector<8x16xf32>
    %51 = arith.truncf %50 : vector<8x16xf32> to vector<8x16xbf16>
    %c16 = arith.constant 16 : index
    %c0_16 = arith.constant 0 : index
    %52 = vector.load %arg3[%c16, %c0_16] : memref<64x32xbf16, #tpu.memory_space<vmem>>, vector<16x32xbf16>
    %cst_17 = arith.constant dense<0.000000e+00> : vector<8x32xf32>
    %53 = tpu.matmul %51, %52, %cst_17 {dimension_numbers = #tpu.dot_dimension_numbers<[1], [0], [0], [1], [0, 0, 1, 1], [], []>} : vector<8x16xbf16>, vector<16x32xbf16>, vector<8x32xf32> -> vector<8x32xf32>
    %54 = arith.addf %31, %53 : vector<8x32xf32>
    %55 = vector.extract_strided_slice %7 {offsets = [0, 32], sizes = [8, 16], strides = [1, 1]} : vector<8x64xf32> to vector<8x16xf32>
    %56 = arith.truncf %55 : vector<8x16xf32> to vector<8x16xbf16>
    %57 = vector.extract_strided_slice %8 {offsets = [0, 32], sizes = [8, 16], strides = [1, 1]} : vector<8x64xf32> to vector<8x16xf32>
    %58 = arith.truncf %57 : vector<8x16xf32> to vector<8x16xbf16>
    %59 = vector.extract_strided_slice %9 {offsets = [0, 32], sizes = [8, 16], strides = [1, 1]} : vector<8x64xf32> to vector<8x16xf32>
    %60 = arith.truncf %59 : vector<8x16xf32> to vector<8x16xbf16>
    %cst_18 = arith.constant dense<0.000000e+00> : vector<8x8xf32>
    %61 = tpu.matmul %56, %58, %cst_18 {dimension_numbers = #tpu.dot_dimension_numbers<[1], [1], [0], [0], [0, 0, 1, 0], [], []>} : vector<8x16xbf16>, vector<8x16xbf16>, vector<8x8xf32> -> vector<8x8xf32>
    %cst_19 = arith.constant dense<0xFF800000> : vector<8xf32>
    %62 = vector.multi_reduction <maximumf>, %61, %cst_19 [1] : vector<8x8xf32> to vector<8xf32>
    %63 = vector.shape_cast %62 : vector<8xf32> to vector<8x1xf32>
    %64 = vector.broadcast %63 : vector<8x1xf32> to vector<8x8xf32>
    %65 = arith.subf %61, %64 : vector<8x8xf32>
    %66 = math.exp %65 : vector<8x8xf32>
    %cst_20 = arith.constant dense<0.000000e+00> : vector<8xf32>
    %67 = vector.multi_reduction <add>, %66, %cst_20 [1] : vector<8x8xf32> to vector<8xf32>
    %68 = vector.shape_cast %67 : vector<8xf32> to vector<8x1xf32>
    %69 = tpu.reciprocal %68 {approx = true} : vector<8x1xf32> -> vector<8x1xf32>
    %70 = arith.truncf %66 : vector<8x8xf32> to vector<8x8xbf16>
    %cst_21 = arith.constant dense<0.000000e+00> : vector<8x16xf32>
    %71 = tpu.matmul %70, %60, %cst_21 {dimension_numbers = #tpu.dot_dimension_numbers<[1], [0], [0], [1], [0, 0, 1, 1], [], []>} : vector<8x8xbf16>, vector<8x16xbf16>, vector<8x16xf32> -> vector<8x16xf32>
    %72 = vector.broadcast %69 : vector<8x1xf32> to vector<8x16xf32>
    %73 = arith.mulf %71, %72 : vector<8x16xf32>
    %74 = arith.truncf %73 : vector<8x16xf32> to vector<8x16xbf16>
    %c32 = arith.constant 32 : index
    %c0_22 = arith.constant 0 : index
    %75 = vector.load %arg3[%c32, %c0_22] : memref<64x32xbf16, #tpu.memory_space<vmem>>, vector<16x32xbf16>
    %cst_23 = arith.constant dense<0.000000e+00> : vector<8x32xf32>
    %76 = tpu.matmul %74, %75, %cst_23 {dimension_numbers = #tpu.dot_dimension_numbers<[1], [0], [0], [1], [0, 0, 1, 1], [], []>} : vector<8x16xbf16>, vector<16x32xbf16>, vector<8x32xf32> -> vector<8x32xf32>
    %77 = arith.addf %54, %76 : vector<8x32xf32>
    %78 = vector.extract_strided_slice %7 {offsets = [0, 48], sizes = [8, 16], strides = [1, 1]} : vector<8x64xf32> to vector<8x16xf32>
    %79 = arith.truncf %78 : vector<8x16xf32> to vector<8x16xbf16>
    %80 = vector.extract_strided_slice %8 {offsets = [0, 48], sizes = [8, 16], strides = [1, 1]} : vector<8x64xf32> to vector<8x16xf32>
    %81 = arith.truncf %80 : vector<8x16xf32> to vector<8x16xbf16>
    %82 = vector.extract_strided_slice %9 {offsets = [0, 48], sizes = [8, 16], strides = [1, 1]} : vector<8x64xf32> to vector<8x16xf32>
    %83 = arith.truncf %82 : vector<8x16xf32> to vector<8x16xbf16>
    %cst_24 = arith.constant dense<0.000000e+00> : vector<8x8xf32>
    %84 = tpu.matmul %79, %81, %cst_24 {dimension_numbers = #tpu.dot_dimension_numbers<[1], [1], [0], [0], [0, 0, 1, 0], [], []>} : vector<8x16xbf16>, vector<8x16xbf16>, vector<8x8xf32> -> vector<8x8xf32>
    %cst_25 = arith.constant dense<0xFF800000> : vector<8xf32>
    %85 = vector.multi_reduction <maximumf>, %84, %cst_25 [1] : vector<8x8xf32> to vector<8xf32>
    %86 = vector.shape_cast %85 : vector<8xf32> to vector<8x1xf32>
    %87 = vector.broadcast %86 : vector<8x1xf32> to vector<8x8xf32>
    %88 = arith.subf %84, %87 : vector<8x8xf32>
    %89 = math.exp %88 : vector<8x8xf32>
    %cst_26 = arith.constant dense<0.000000e+00> : vector<8xf32>
    %90 = vector.multi_reduction <add>, %89, %cst_26 [1] : vector<8x8xf32> to vector<8xf32>
    %91 = vector.shape_cast %90 : vector<8xf32> to vector<8x1xf32>
    %92 = tpu.reciprocal %91 {approx = true} : vector<8x1xf32> -> vector<8x1xf32>
    %93 = arith.truncf %89 : vector<8x8xf32> to vector<8x8xbf16>
    %cst_27 = arith.constant dense<0.000000e+00> : vector<8x16xf32>
    %94 = tpu.matmul %93, %83, %cst_27 {dimension_numbers = #tpu.dot_dimension_numbers<[1], [0], [0], [1], [0, 0, 1, 1], [], []>} : vector<8x8xbf16>, vector<8x16xbf16>, vector<8x16xf32> -> vector<8x16xf32>
    %95 = vector.broadcast %92 : vector<8x1xf32> to vector<8x16xf32>
    %96 = arith.mulf %94, %95 : vector<8x16xf32>
    %97 = arith.truncf %96 : vector<8x16xf32> to vector<8x16xbf16>
    %c48 = arith.constant 48 : index
    %c0_28 = arith.constant 0 : index
    %98 = vector.load %arg3[%c48, %c0_28] : memref<64x32xbf16, #tpu.memory_space<vmem>>, vector<16x32xbf16>
    %cst_29 = arith.constant dense<0.000000e+00> : vector<8x32xf32>
    %99 = tpu.matmul %97, %98, %cst_29 {dimension_numbers = #tpu.dot_dimension_numbers<[1], [0], [0], [1], [0, 0, 1, 1], [], []>} : vector<8x16xbf16>, vector<16x32xbf16>, vector<8x32xf32> -> vector<8x32xf32>
    %100 = arith.addf %77, %99 : vector<8x32xf32>
    %101 = vector.extract_strided_slice %6 {offsets = [8, 0], sizes = [8, 64], strides = [1, 1]} : vector<16x192xf32> to vector<8x64xf32>
    %102 = vector.extract_strided_slice %6 {offsets = [8, 64], sizes = [8, 64], strides = [1, 1]} : vector<16x192xf32> to vector<8x64xf32>
    %103 = vector.extract_strided_slice %6 {offsets = [8, 128], sizes = [8, 64], strides = [1, 1]} : vector<16x192xf32> to vector<8x64xf32>
    %104 = vector.extract_strided_slice %101 {offsets = [0, 0], sizes = [8, 16], strides = [1, 1]} : vector<8x64xf32> to vector<8x16xf32>
    %105 = arith.truncf %104 : vector<8x16xf32> to vector<8x16xbf16>
    %106 = vector.extract_strided_slice %102 {offsets = [0, 0], sizes = [8, 16], strides = [1, 1]} : vector<8x64xf32> to vector<8x16xf32>
    %107 = arith.truncf %106 : vector<8x16xf32> to vector<8x16xbf16>
    %108 = vector.extract_strided_slice %103 {offsets = [0, 0], sizes = [8, 16], strides = [1, 1]} : vector<8x64xf32> to vector<8x16xf32>
    %109 = arith.truncf %108 : vector<8x16xf32> to vector<8x16xbf16>
    %cst_30 = arith.constant dense<0.000000e+00> : vector<8x8xf32>
    %110 = tpu.matmul %105, %107, %cst_30 {dimension_numbers = #tpu.dot_dimension_numbers<[1], [1], [0], [0], [0, 0, 1, 0], [], []>} : vector<8x16xbf16>, vector<8x16xbf16>, vector<8x8xf32> -> vector<8x8xf32>
    %cst_31 = arith.constant dense<0xFF800000> : vector<8xf32>
    %111 = vector.multi_reduction <maximumf>, %110, %cst_31 [1] : vector<8x8xf32> to vector<8xf32>
    %112 = vector.shape_cast %111 : vector<8xf32> to vector<8x1xf32>
    %113 = vector.broadcast %112 : vector<8x1xf32> to vector<8x8xf32>
    %114 = arith.subf %110, %113 : vector<8x8xf32>
    %115 = math.exp %114 : vector<8x8xf32>
    %cst_32 = arith.constant dense<0.000000e+00> : vector<8xf32>
    %116 = vector.multi_reduction <add>, %115, %cst_32 [1] : vector<8x8xf32> to vector<8xf32>
    %117 = vector.shape_cast %116 : vector<8xf32> to vector<8x1xf32>
    %118 = tpu.reciprocal %117 {approx = true} : vector<8x1xf32> -> vector<8x1xf32>
    %119 = arith.truncf %115 : vector<8x8xf32> to vector<8x8xbf16>
    %cst_33 = arith.constant dense<0.000000e+00> : vector<8x16xf32>
    %120 = tpu.matmul %119, %109, %cst_33 {dimension_numbers = #tpu.dot_dimension_numbers<[1], [0], [0], [1], [0, 0, 1, 1], [], []>} : vector<8x8xbf16>, vector<8x16xbf16>, vector<8x16xf32> -> vector<8x16xf32>
    %121 = vector.broadcast %118 : vector<8x1xf32> to vector<8x16xf32>
    %122 = arith.mulf %120, %121 : vector<8x16xf32>
    %123 = arith.truncf %122 : vector<8x16xf32> to vector<8x16xbf16>
    %c0_34 = arith.constant 0 : index
    %c0_35 = arith.constant 0 : index
    %124 = vector.load %arg3[%c0_34, %c0_35] : memref<64x32xbf16, #tpu.memory_space<vmem>>, vector<16x32xbf16>
    %cst_36 = arith.constant dense<0.000000e+00> : vector<8x32xf32>
    %125 = tpu.matmul %123, %124, %cst_36 {dimension_numbers = #tpu.dot_dimension_numbers<[1], [0], [0], [1], [0, 0, 1, 1], [], []>} : vector<8x16xbf16>, vector<16x32xbf16>, vector<8x32xf32> -> vector<8x32xf32>
    %126 = vector.extract_strided_slice %101 {offsets = [0, 16], sizes = [8, 16], strides = [1, 1]} : vector<8x64xf32> to vector<8x16xf32>
    %127 = arith.truncf %126 : vector<8x16xf32> to vector<8x16xbf16>
    %128 = vector.extract_strided_slice %102 {offsets = [0, 16], sizes = [8, 16], strides = [1, 1]} : vector<8x64xf32> to vector<8x16xf32>
    %129 = arith.truncf %128 : vector<8x16xf32> to vector<8x16xbf16>
    %130 = vector.extract_strided_slice %103 {offsets = [0, 16], sizes = [8, 16], strides = [1, 1]} : vector<8x64xf32> to vector<8x16xf32>
    %131 = arith.truncf %130 : vector<8x16xf32> to vector<8x16xbf16>
    %cst_37 = arith.constant dense<0.000000e+00> : vector<8x8xf32>
    %132 = tpu.matmul %127, %129, %cst_37 {dimension_numbers = #tpu.dot_dimension_numbers<[1], [1], [0], [0], [0, 0, 1, 0], [], []>} : vector<8x16xbf16>, vector<8x16xbf16>, vector<8x8xf32> -> vector<8x8xf32>
    %cst_38 = arith.constant dense<0xFF800000> : vector<8xf32>
    %133 = vector.multi_reduction <maximumf>, %132, %cst_38 [1] : vector<8x8xf32> to vector<8xf32>
    %134 = vector.shape_cast %133 : vector<8xf32> to vector<8x1xf32>
    %135 = vector.broadcast %134 : vector<8x1xf32> to vector<8x8xf32>
    %136 = arith.subf %132, %135 : vector<8x8xf32>
    %137 = math.exp %136 : vector<8x8xf32>
    %cst_39 = arith.constant dense<0.000000e+00> : vector<8xf32>
    %138 = vector.multi_reduction <add>, %137, %cst_39 [1] : vector<8x8xf32> to vector<8xf32>
    %139 = vector.shape_cast %138 : vector<8xf32> to vector<8x1xf32>
    %140 = tpu.reciprocal %139 {approx = true} : vector<8x1xf32> -> vector<8x1xf32>
    %141 = arith.truncf %137 : vector<8x8xf32> to vector<8x8xbf16>
    %cst_40 = arith.constant dense<0.000000e+00> : vector<8x16xf32>
    %142 = tpu.matmul %141, %131, %cst_40 {dimension_numbers = #tpu.dot_dimension_numbers<[1], [0], [0], [1], [0, 0, 1, 1], [], []>} : vector<8x8xbf16>, vector<8x16xbf16>, vector<8x16xf32> -> vector<8x16xf32>
    %143 = vector.broadcast %140 : vector<8x1xf32> to vector<8x16xf32>
    %144 = arith.mulf %142, %143 : vector<8x16xf32>
    %145 = arith.truncf %144 : vector<8x16xf32> to vector<8x16xbf16>
    %c16_41 = arith.constant 16 : index
    %c0_42 = arith.constant 0 : index
    %146 = vector.load %arg3[%c16_41, %c0_42] : memref<64x32xbf16, #tpu.memory_space<vmem>>, vector<16x32xbf16>
    %cst_43 = arith.constant dense<0.000000e+00> : vector<8x32xf32>
    %147 = tpu.matmul %145, %146, %cst_43 {dimension_numbers = #tpu.dot_dimension_numbers<[1], [0], [0], [1], [0, 0, 1, 1], [], []>} : vector<8x16xbf16>, vector<16x32xbf16>, vector<8x32xf32> -> vector<8x32xf32>
    %148 = arith.addf %125, %147 : vector<8x32xf32>
    %149 = vector.extract_strided_slice %101 {offsets = [0, 32], sizes = [8, 16], strides = [1, 1]} : vector<8x64xf32> to vector<8x16xf32>
    %150 = arith.truncf %149 : vector<8x16xf32> to vector<8x16xbf16>
    %151 = vector.extract_strided_slice %102 {offsets = [0, 32], sizes = [8, 16], strides = [1, 1]} : vector<8x64xf32> to vector<8x16xf32>
    %152 = arith.truncf %151 : vector<8x16xf32> to vector<8x16xbf16>
    %153 = vector.extract_strided_slice %103 {offsets = [0, 32], sizes = [8, 16], strides = [1, 1]} : vector<8x64xf32> to vector<8x16xf32>
    %154 = arith.truncf %153 : vector<8x16xf32> to vector<8x16xbf16>
    %cst_44 = arith.constant dense<0.000000e+00> : vector<8x8xf32>
    %155 = tpu.matmul %150, %152, %cst_44 {dimension_numbers = #tpu.dot_dimension_numbers<[1], [1], [0], [0], [0, 0, 1, 0], [], []>} : vector<8x16xbf16>, vector<8x16xbf16>, vector<8x8xf32> -> vector<8x8xf32>
    %cst_45 = arith.constant dense<0xFF800000> : vector<8xf32>
    %156 = vector.multi_reduction <maximumf>, %155, %cst_45 [1] : vector<8x8xf32> to vector<8xf32>
    %157 = vector.shape_cast %156 : vector<8xf32> to vector<8x1xf32>
    %158 = vector.broadcast %157 : vector<8x1xf32> to vector<8x8xf32>
    %159 = arith.subf %155, %158 : vector<8x8xf32>
    %160 = math.exp %159 : vector<8x8xf32>
    %cst_46 = arith.constant dense<0.000000e+00> : vector<8xf32>
    %161 = vector.multi_reduction <add>, %160, %cst_46 [1] : vector<8x8xf32> to vector<8xf32>
    %162 = vector.shape_cast %161 : vector<8xf32> to vector<8x1xf32>
    %163 = tpu.reciprocal %162 {approx = true} : vector<8x1xf32> -> vector<8x1xf32>
    %164 = arith.truncf %160 : vector<8x8xf32> to vector<8x8xbf16>
    %cst_47 = arith.constant dense<0.000000e+00> : vector<8x16xf32>
    %165 = tpu.matmul %164, %154, %cst_47 {dimension_numbers = #tpu.dot_dimension_numbers<[1], [0], [0], [1], [0, 0, 1, 1], [], []>} : vector<8x8xbf16>, vector<8x16xbf16>, vector<8x16xf32> -> vector<8x16xf32>
    %166 = vector.broadcast %163 : vector<8x1xf32> to vector<8x16xf32>
    %167 = arith.mulf %165, %166 : vector<8x16xf32>
    %168 = arith.truncf %167 : vector<8x16xf32> to vector<8x16xbf16>
    %c32_48 = arith.constant 32 : index
    %c0_49 = arith.constant 0 : index
    %169 = vector.load %arg3[%c32_48, %c0_49] : memref<64x32xbf16, #tpu.memory_space<vmem>>, vector<16x32xbf16>
    %cst_50 = arith.constant dense<0.000000e+00> : vector<8x32xf32>
    %170 = tpu.matmul %168, %169, %cst_50 {dimension_numbers = #tpu.dot_dimension_numbers<[1], [0], [0], [1], [0, 0, 1, 1], [], []>} : vector<8x16xbf16>, vector<16x32xbf16>, vector<8x32xf32> -> vector<8x32xf32>
    %171 = arith.addf %148, %170 : vector<8x32xf32>
    %172 = vector.extract_strided_slice %101 {offsets = [0, 48], sizes = [8, 16], strides = [1, 1]} : vector<8x64xf32> to vector<8x16xf32>
    %173 = arith.truncf %172 : vector<8x16xf32> to vector<8x16xbf16>
    %174 = vector.extract_strided_slice %102 {offsets = [0, 48], sizes = [8, 16], strides = [1, 1]} : vector<8x64xf32> to vector<8x16xf32>
    %175 = arith.truncf %174 : vector<8x16xf32> to vector<8x16xbf16>
    %176 = vector.extract_strided_slice %103 {offsets = [0, 48], sizes = [8, 16], strides = [1, 1]} : vector<8x64xf32> to vector<8x16xf32>
    %177 = arith.truncf %176 : vector<8x16xf32> to vector<8x16xbf16>
    %cst_51 = arith.constant dense<0.000000e+00> : vector<8x8xf32>
    %178 = tpu.matmul %173, %175, %cst_51 {dimension_numbers = #tpu.dot_dimension_numbers<[1], [1], [0], [0], [0, 0, 1, 0], [], []>} : vector<8x16xbf16>, vector<8x16xbf16>, vector<8x8xf32> -> vector<8x8xf32>
    %cst_52 = arith.constant dense<0xFF800000> : vector<8xf32>
    %179 = vector.multi_reduction <maximumf>, %178, %cst_52 [1] : vector<8x8xf32> to vector<8xf32>
    %180 = vector.shape_cast %179 : vector<8xf32> to vector<8x1xf32>
    %181 = vector.broadcast %180 : vector<8x1xf32> to vector<8x8xf32>
    %182 = arith.subf %178, %181 : vector<8x8xf32>
    %183 = math.exp %182 : vector<8x8xf32>
    %cst_53 = arith.constant dense<0.000000e+00> : vector<8xf32>
    %184 = vector.multi_reduction <add>, %183, %cst_53 [1] : vector<8x8xf32> to vector<8xf32>
    %185 = vector.shape_cast %184 : vector<8xf32> to vector<8x1xf32>
    %186 = tpu.reciprocal %185 {approx = true} : vector<8x1xf32> -> vector<8x1xf32>
    %187 = arith.truncf %183 : vector<8x8xf32> to vector<8x8xbf16>
    %cst_54 = arith.constant dense<0.000000e+00> : vector<8x16xf32>
    %188 = tpu.matmul %187, %177, %cst_54 {dimension_numbers = #tpu.dot_dimension_numbers<[1], [0], [0], [1], [0, 0, 1, 1], [], []>} : vector<8x8xbf16>, vector<8x16xbf16>, vector<8x16xf32> -> vector<8x16xf32>
    %189 = vector.broadcast %186 : vector<8x1xf32> to vector<8x16xf32>
    %190 = arith.mulf %188, %189 : vector<8x16xf32>
    %191 = arith.truncf %190 : vector<8x16xf32> to vector<8x16xbf16>
    %c48_55 = arith.constant 48 : index
    %c0_56 = arith.constant 0 : index
    %192 = vector.load %arg3[%c48_55, %c0_56] : memref<64x32xbf16, #tpu.memory_space<vmem>>, vector<16x32xbf16>
    %cst_57 = arith.constant dense<0.000000e+00> : vector<8x32xf32>
    %193 = tpu.matmul %191, %192, %cst_57 {dimension_numbers = #tpu.dot_dimension_numbers<[1], [0], [0], [1], [0, 0, 1, 1], [], []>} : vector<8x16xbf16>, vector<16x32xbf16>, vector<8x32xf32> -> vector<8x32xf32>
    %194 = arith.addf %171, %193 : vector<8x32xf32>
    %195 = tpu.concatenate %100, %194 in 0 : vector<8x32xf32>, vector<8x32xf32> -> vector<16x32xf32>
    %c0_58 = arith.constant 0 : index
    %c0_59 = arith.constant 0 : index
    %196 = vector.load %arg4[%c0_58, %c0_59] : memref<1x32xf32, #tpu.memory_space<vmem>>, vector<1x32xf32>
    %197 = vector.broadcast %196 : vector<1x32xf32> to vector<16x32xf32>
    %198 = arith.addf %195, %197 : vector<16x32xf32>
    %c0_60 = arith.constant 0 : index
    %c0_61 = arith.constant 0 : index
    %199 = vector.load %arg5[%c0_60, %c0_61] : memref<16x32xf32, #tpu.memory_space<vmem>>, vector<16x32xf32>
    tpu.vector_store %arg5[%c0_60, %c0_61], %198 {strides = array<i32>} : memref<16x32xf32, #tpu.memory_space<vmem>>, vector<16x32xf32>,
    return
  }
}

</mosaic_0001>

<bundles_post_ra>
// kernel: layout_attention.1
= control target key start
LH: loop header
LB: loop body
LE: loop exit
PB: predicated region body
PF: predicated region fallthrough
CT: control target
= control target key end

     0   :  { %10 = vsyncpa [#allocation3], 0  ;;  %s2081_s0 = inlined_call_operand.vmem [shape: f32[16,64], index: 0, kind: input, shape index: {}]   ;;  %s2082_s1 = inlined_call_operand.hbm [shape: bf16[64,192], index: 1, kind: input, shape index: {}]   ;;  %s2083_s2 = inlined_call_operand.vmem [shape: f32[1,192], index: 2, kind: input, shape index: {}]   ;;  %s2084_s3 = inlined_call_operand.vmem [shape: bf16[64,32], index: 3, kind: input, shape index: {}]   ;;  %s2085_s4 = inlined_call_operand.vmem [shape: f32[1,32], index: 4, kind: input, shape index: {}]   ;;  %s2086_s5 = inlined_call_operand.hbm [shape: f32[16,32], index: 5, kind: output, shape index: {}]  }
   0x1   :  { %11 = vsyncpa [#allocation4], 0  ;;  %s1782_s18 = smov [#allocation2]  }
   0x2   :  { %s19_s19 = sshll.u32 %s1782_s18, 4  ;;  %s20_s19 = int_to_ptr.vmem [resolvable:$true] %s19_s19 }
   0x3   :  { %s1746_s20 = scalar_lea.vmem %s20_s19, 1024  ;;  %p1751_p1 = scmp.lt.s32.totalorder %s20_s19, %s20_s19 }
   0x4   :  { %p1747_p0 = scmp.ne.s32.totalorder %s20_s19, %s1746_s20  ;;  %p1752_p2 = scmp.lt.s32.totalorder %s1746_s20, %s1746_s20 }
   0x6   :  { %p1753_p3 = por %p1752_p2, %p1751_p1 }
   0x8   :  { %p1754_p4 = pnand %p1753_p3, %p1747_p0 }
   0xa   :  { %1757 = shalt.err (!%p1754_p4)
}
   0xb   :  { %s1783_s21 = smov 128   ;;  %s1784_s22 = smov 8  }
   0xc   :  { %25 = dma.hbm_to_vmem [thread:$0]  %s2082_s1, 1024, %s20_s19, [#allocation3], %s1783_s21, %s1783_s21, %s1784_s22  }
   0xd   :  { %1778 = dma.done.wait [#allocation3], 1024  }
   0xe   :  { %1779 = vsyncadd [#allocation3], 4294966272  ;;  %v1785_v0 = vmov 0   ;;  %v1690_v1 = vld [vmem:[#allocation2 + $0x34] ss:$8 sps:$4 sm:$0xff]   ;;  %v36_v9 = vld [vmem:[%s2081_s0] sm:$0xff]  ;;  %v49_v12 = vlaneseq }
   0xf   :  { %135 = vmatprep.mubr.bf16.mxu0 %v1785_v0  ;;  %v1692_v2 = vld [vmem:[#allocation2 + $0x30] ss:$8 sps:$4 sm:$0xff]   ;;  %111 = vmatprep.subr.bf16.mxu0 %v1690_v1  ;;  %v1693_v3 = vld [vmem:[#allocation2 + $0x24] ss:$8 sps:$4 sm:$0xff]   ;;  %v1695_v4 = vld [vmem:[#allocation2 + $0x20] ss:$8 sps:$4 sm:$0xff]  }
  0x10   :  { %112 = vmatpush1.bf16.msra.mxu0 %v1692_v2  ;;  %v1696_v5 = vld [vmem:[#allocation2 + $0x14] ss:$8 sps:$4 sm:$0xff]   ;;  %v1698_v6 = vld [vmem:[#allocation2 + $0x10] ss:$8 sps:$4 sm:$0xff]   ;;  %v1699_v7 = vld [vmem:[#allocation2 + $0x4] ss:$8 sps:$4 sm:$0xff]  }
  0x11   :  { %113 = vmatprep.subr.bf16.mxu0 %v1693_v3  ;;  %v1701_v8 = vld [vmem:[#allocation2] ss:$8 sps:$4 sm:$0xff]   ;;  %vm99_vm0 = vcmask 523264   ;;  %v50_v13 = vshrl.u32 %v49_v12, 7  ;;  %v1786_v14 = vmov 0.0   ;;  %vm1787_vm1 = vmmov 0  }
  0x12   :  { %v37_v10 = vld [vmem:[%s2081_s0 + $0x8] sm:$0xff]  ;;  %1532 = vmatprep.subr.bf16.mxu1 %v1786_v14  ;;  %v47_v16 = vld [vmem:[%s2083_s2] sm:$0x3]  ;;  %1534 = vmatprep.mubr.msk.bf16.mxu1 %vm1787_vm1, %v1786_v14  ;;  %s1788_s0 = smov 112   ;;  %s1789_s2 = smov 64   ;;  %vm151_vm2 = vcmask 130048  }
  0x13   :  { %v38_v11 = vpack.c.bf16 %v37_v10, %v36_v9  ;;  %v51_v15 = vsub.s32 0, %v50_v13  ;;  %s1790_s30 = smov 48   ;;  %v55_v24 = vsub.s32 1, %v50_v13  ;;  %vm213_vm3 = vcmask 1043456   ;;  %s1791_s6 = smov 96   ;;  %v1899_v59 = vld [vmem:[%s2084_s3 + $0x8] sm:$0xff]  }
  0x14   :  { %114 = vmatpush1.bf16.msra.mxu0 %v1695_v4  ;;  %vm198_vm4 = vcmask 64512   ;;  %s1792_s7 = smov 32   ;;  %s1793_s10 = smov 16   ;;  %v1910_v60 = vld [vmem:[%s2084_s3] sm:$0xff]   ;;  %vm1426_vm5 = vcmask 261120  }
  0x15   :  { %115 = vmatprep.subr.bf16.mxu0 %v1696_v5  ;;  %v52_v17 = vrot.slane %v47_v16, %v51_v15  ;;  %v1857_v25 = vrot.slane %v47_v16, %v55_v24  ;;  %s1794_s11 = smov 80  }
  0x18   :  { %116 = vmatpush1.bf16.msra.mxu0 %v1698_v6 }
  0x19   :  { %117 = vmatprep.subr.bf16.mxu0 %v1699_v7 }
  0x1c   :  { %118 = vmatpush1.bf16.msra.mxu0 %v1701_v8 }
  0x1d   :  { %1544 = vmatprep.subr.bf16.mxu0 %v1786_v14 }
  0x1f   :  { %1454 = vmatmul.mubr.msk.bf16.vlgmr.msra.gmra.mxu0 %vm99_vm0, %v38_v11 }
  0x20   :  { %1546 = vmatprep.mubr.msk.bf16.mxu0 %vm1787_vm1, %v1786_v14 }
  0xdf   :  { %v137_v18 = vpop.f32.mrf.mxu0 }
  0xe0   :  { %v138_v19 = vadd.f32 %v137_v18, %v52_v17 }
  0xe1   :  { %v139_v20 = vpop.f32.mrf.mxu0 }
  0xe2   :  { %v1847_v21 = vpack.c.bf16 %v138_v19, %v138_v19  ;;  %v140_v27 = vadd.f32 %v139_v20, %v1857_v25 }
  0xe3   :  { %v141_v22 = vpop.f32.mrf.mxu0 }
  0xe4   :  { %v1849_v23 = vadd.f32 %v141_v22, %v52_v17  ;;  %261 = vrot.lane.b32.xlu1 %v1847_v21, %s1788_s0  ;;  %149 = vrot.lane.b32.xlu0 %v1847_v21, %s1789_s2  ;;  %v1862_v30 = vpack.c.bf16 %v140_v27, %v140_v27 }
  0xe5   :  { %v1877_v36 = vpop.f32.mrf.mxu0 }
  0xe6   :  { %v215_v32 = vsel %vm213_vm3, %v1862_v30, 0 }
  0xe8   :  { %263 = vrot.lane.b32.xlu0 %v1847_v21, %s1790_s30 }
 0x156   :  { %v150_v26 = vpop.permute.xlu0 %149  ;;  %v262_v33 = vpop.permute.xlu1 %261 }
 0x157   :  { %v156_v28 = vsel %vm151_vm2, %v150_v26, 0 }
 0x158   :  { %1533 = vmatpush3.bf16.xpose.msra.mxu1 %v156_v28 }
 0x159   :  { %1538 = vmatprep.subr.bf16.mxu1 %v1786_v14 }
 0x15a   :  { %v264_v29 = vpop.permute.xlu0 %263 }
 0x15b   :  { %v269_v31 = vsel %vm151_vm2, %v264_v29, 0 }
 0x15c   :  { %1545 = vmatpush3.bf16.xpose.msra.mxu0 %v269_v31 }
 0x15d   :  { %1556 = vmatprep.subr.bf16.mxu0 %v1786_v14 }
 0x15f   :  { %1535 = vmatmul.mubr.msk.bf16.vlgmr.msra.gmra.mxu1 %vm151_vm2, %v1847_v21 }
 0x160   :  { %1539 = vmatpush3.bf16.msra.mxu1 %v215_v32  ;;  %1540 = vmatprep.mubr.msk.bf16.mxu1 %vm1787_vm1, %v1786_v14 }
 0x161   :  { %1550 = vmatprep.subr.bf16.mxu1 %v1786_v14 }
 0x163   :  { %1547 = vmatmul.mubr.msk.bf16.vlgmr.msra.gmra.mxu0 %vm151_vm2, %v262_v33 }
 0x164   :  { %1558 = vmatprep.mubr.msk.bf16.mxu0 %vm1787_vm1, %v1786_v14  ;;  %1557 = vmatpush3.bf16.msra.mxu0 %v1899_v59 }
 0x165   :  { %1568 = vmatprep.subr.bf16.mxu0 %v1786_v14 }
 0x21f   :  { %v192_v34 = vpop.f32.mrf.mxu1 }
 0x220   :  { %v199_v35 = vsel %vm198_vm4, %v192_v34, -inf }
 0x221   :  { %200 = vmax.xlane.f32.xlu1 %v199_v35  ;;  %v1536_v37 = vpop.f32.mrf.mxu1 }
 0x223   :  { %v195_v38 = vpop.f32.mrf.mxu1  ;;  %v305_v39 = vpop.f32.mrf.mxu0 }
 0x224   :  { %v311_v40 = vsel %vm198_vm4, %v305_v39, -inf }
 0x225   :  { %v1537_v41 = vpop.f32.mrf.mxu1  ;;  %312 = vmax.xlane.f32.xlu0 %v311_v40  ;;  %v1548_v42 = vpop.f32.mrf.mxu0 }
 0x227   :  { %v308_v43 = vpop.f32.mrf.mxu0 }
 0x229   :  { %v1549_v44 = vpop.f32.mrf.mxu0 }
 0x23b   :  { %323 = vrot.lane.b32.xlu0 %v1862_v30, %s1788_s0 }
 0x23f   :  { %473 = vrot.lane.b32.xlu0 %v1847_v21, %s1791_s6 }
 0x2aa   :  { %v201_v45 = vpop.xlane.xlu1 %200 }
 0x2ab   :  { %v202_v46 = vsub.f32 %v192_v34, %v201_v45 }
 0x2ad   :  { %v203_v47 = vmul.f32 1.442695, %v202_v46  ;;  %v1945_v46 = vpack.c.bf16 %v1849_v23, %v1849_v23 }
 0x2ae   :  { %v313_v48 = vpop.xlane.xlu0 %312 }
 0x2af   :  { %1706 = vpow2.f32 %v203_v47  ;;  %v314_v49 = vsub.f32 %v305_v39, %v313_v48  ;;  %v1952_v47 = vld [vmem:[%s2084_s3 + $0x10] sm:$0xff]  }
 0x2b1   :  { %v315_v50 = vmul.f32 1.442695, %v314_v49 }
 0x2b2   :  { %v324_v52 = vpop.permute.xlu0 %323 }
 0x2b3   :  { %1708 = vpow2.f32 %v315_v50  ;;  %v329_v54 = vsel %vm213_vm3, %v324_v52, 0 }
 0x2b6   :  { %v474_v16 = vpop.permute.xlu0 %473 }
 0x2bc   :  { %v1707_v51 = vpop.eup %1706 }
 0x2bd   :  { %v209_v53 = vpack.c.bf16 %v1707_v51, %v1707_v51  ;;  %v205_v58 = vsel %vm198_vm4, %v1707_v51, 0.0 }
 0x2bf   :  { %1541 = vmatmul.mubr.msk.bf16.vlgmr.msra.gmra.mxu1 %vm198_vm4, %v209_v53 }
 0x2c0   :  { %v1709_v55 = vpop.eup %1708  ;;  %1551 = vmatpush3.bf16.msra.mxu1 %v329_v54  ;;  %1552 = vmatprep.mubr.msk.bf16.mxu1 %vm1787_vm1, %v1786_v14 }
 0x2c1   :  { %v317_v56 = vsel %vm198_vm4, %v1709_v55, 0.0  ;;  %1562 = vmatprep.subr.bf16.mxu1 %v1786_v14  ;;  %v321_v57 = vpack.c.bf16 %v1709_v55, %v1709_v55 }
 0x2c2   :  { %318 = vadd.xlane.f32.xlu1 %v317_v56 }
 0x2c7   :  { %1553 = vmatmul.mubr.msk.bf16.vlgmr.msra.gmra.mxu1 %vm198_vm4, %v321_v57 }
 0x2c8   :  { %1564 = vmatprep.mubr.msk.bf16.mxu1 %vm1787_vm1, %v1786_v14  ;;  %1563 = vmatpush3.bf16.msra.mxu1 %v1910_v60 }
 0x2c9   :  { %1574 = vmatprep.subr.bf16.mxu1 %v1786_v14 }
 0x2d3   :  { %475 = vrot.lane.b32.xlu1 %v1847_v21, %s1792_s7 }
 0x2f7   :  { %206 = vadd.xlane.f32.xlu1 %v205_v58 }
 0x308   :  { %638 = vrot.lane.b32.xlu1 %v1847_v21, %s1793_s10 }
 0x30c   :  { %636 = vrot.lane.b32.xlu1 %v1847_v21, %s1794_s11 }
 0x34b   :  { %v319_v61 = vpop.xlane.xlu1 %318 }
 0x34c   :  { %1710 = vrcp.f32 %v319_v61 }
 0x34f   :  { %v476_v62 = vpop.permute.xlu1 %475 }
 0x350   :  { %v481_v10 = vsel %vm151_vm2, %v476_v62, 0 }
 0x359   :  { %v1711_v4 = vpop.eup %1710 }
 0x37f   :  { %v251_v63 = vpop.f32.mrf.mxu1 }
 0x380   :  { %v207_v0 = vpop.xlane.xlu1 %206 }
 0x381   :  { %1712 = vrcp.f32 %v207_v0  ;;  %v1542_v1 = vpop.f32.mrf.mxu1 }
 0x383   :  { %v254_v2 = vpop.f32.mrf.mxu1 }
 0x384   :  { %v639_v41 = vpop.permute.xlu1 %638 }
 0x385   :  { %v1543_v3 = vpop.f32.mrf.mxu1  ;;  %v644_v44 = vsel %vm151_vm2, %v639_v41, 0 }
 0x387   :  { %v365_v5 = vpop.f32.mrf.mxu1 }
 0x388   :  { %v371_v6 = vmul.f32 %v1711_v4, %v365_v5  ;;  %v637_v45 = vpop.permute.xlu1 %636 }
 0x389   :  { %v1554_v7 = vpop.f32.mrf.mxu1 }
 0x38a   :  { %v372_v8 = vpack.c.bf16 %v371_v6, %v371_v6 }
 0x38b   :  { %v368_v9 = vpop.f32.mrf.mxu1 }
 0x38c   :  { %1559 = vmatmul.mubr.msk.bf16.vlgmr.msra.gmra.mxu0 %vm151_vm2, %v372_v8 }
 0x38d   :  { %1569 = vmatpush3.bf16.xpose.msra.mxu0 %v481_v10  ;;  %v1555_v11 = vpop.f32.mrf.mxu1  ;;  %1570 = vmatprep.mubr.msk.bf16.mxu0 %vm1787_vm1, %v1786_v14 }
 0x38e   :  { %v1713_v12 = vpop.eup %1712  ;;  %1580 = vmatprep.subr.bf16.mxu0 %v1786_v14 }
 0x38f   :  { %v257_v13 = vmul.f32 %v1713_v12, %v251_v63 }
 0x391   :  { %v258_v15 = vpack.c.bf16 %v257_v13, %v257_v13 }
 0x393   :  { %1565 = vmatmul.mubr.msk.bf16.vlgmr.msra.gmra.mxu1 %vm151_vm2, %v258_v15 }
 0x394   :  { %1571 = vmatmul.mubr.msk.bf16.vlgmr.msra.gmra.mxu0 %vm151_vm2, %v474_v16  ;;  %1576 = vmatprep.mubr.msk.bf16.mxu1 %vm1787_vm1, %v1786_v14  ;;  %v1989_v16 = vld [vmem:[%s2084_s3 + $0x18] sm:$0xff]  }
 0x395   :  { %1582 = vmatprep.mubr.msk.bf16.mxu0 %vm1787_vm1, %v1786_v14  ;;  %1581 = vmatpush3.bf16.msra.mxu0 %v1952_v47 }
 0x396   :  { %1592 = vmatprep.subr.bf16.mxu0 %v1786_v14 }
 0x44c   :  { %v418_v17 = vpop.f32.mrf.mxu0 }
 0x44e   :  { %v1560_v18 = vpop.f32.mrf.mxu0 }
 0x450   :  { %v421_v19 = vpop.f32.mrf.mxu0 }
 0x452   :  { %v1561_v20 = vpop.f32.mrf.mxu0 }
 0x453   :  { %v467_v21 = vpop.f32.mrf.mxu1 }
 0x454   :  { %v1925_v22 = vadd.f32 %v467_v21, %v418_v17  ;;  %v517_v24 = vpop.f32.mrf.mxu0  ;;  %v144_v17 = vadd.f32 %v1877_v36, %v1857_v25 }
 0x455   :  { %v1566_v26 = vpop.f32.mrf.mxu1  ;;  %v523_v27 = vsel %vm198_vm4, %v517_v24, -inf }
 0x456   :  { %524 = vmax.xlane.f32.xlu0 %v523_v27  ;;  %v1572_v28 = vpop.f32.mrf.mxu0  ;;  %v1995_v20 = vpack.c.bf16 %v144_v17, %v144_v17 }
 0x457   :  { %v470_v29 = vpop.f32.mrf.mxu1 }
 0x458   :  { %v520_v31 = vpop.f32.mrf.mxu0  ;;  %v865_v27 = vsel %vm213_vm3, %v1995_v20, 0 }
 0x459   :  { %v1567_v32 = vpop.f32.mrf.mxu1 }
 0x45a   :  { %v1573_v33 = vpop.f32.mrf.mxu0 }
 0x46c   :  { %534 = vrot.lane.b32.xlu0 %v1862_v30, %s1791_s6 }
 0x4df   :  { %v525_v34 = vpop.xlane.xlu0 %524 }
 0x4e0   :  { %v526_v35 = vsub.f32 %v517_v24, %v525_v34 }
 0x4e2   :  { %v527_v37 = vmul.f32 1.442695, %v526_v35 }
 0x4e3   :  { %v535_v38 = vpop.permute.xlu0 %534 }
 0x4e4   :  { %1714 = vpow2.f32 %v527_v37  ;;  %v540_v39 = vsel %vm213_vm3, %v535_v38, 0 }
 0x4e5   :  { %1575 = vmatpush3.bf16.msra.mxu1 %v540_v39 }
 0x4e6   :  { %1586 = vmatprep.subr.bf16.mxu1 %v1786_v14 }
 0x4f1   :  { %v1715_v40 = vpop.eup %1714 }
 0x4f2   :  { %v529_v42 = vsel %vm198_vm4, %v1715_v40, 0.0  ;;  %v533_v43 = vpack.c.bf16 %v1715_v40, %v1715_v40 }
 0x4f3   :  { %530 = vadd.xlane.f32.xlu0 %v529_v42 }
 0x4f4   :  { %1577 = vmatmul.mubr.msk.bf16.vlgmr.msra.gmra.mxu1 %vm198_vm4, %v533_v43 }
 0x4f5   :  { %1587 = vmatpush3.bf16.xpose.msra.mxu1 %v644_v44  ;;  %1588 = vmatprep.mubr.msk.bf16.mxu1 %vm1787_vm1, %v1786_v14 }
 0x4f6   :  { %1598 = vmatprep.subr.bf16.mxu1 %v1786_v14 }
 0x4fc   :  { %1589 = vmatmul.mubr.msk.bf16.vlgmr.msra.gmra.mxu1 %vm151_vm2, %v637_v45 }
 0x4fd   :  { %1600 = vmatprep.mubr.msk.bf16.mxu1 %vm1787_vm1, %v1786_v14  ;;  %1599 = vmatpush3.bf16.msra.mxu1 %v1989_v16 }
 0x4fe   :  { %1610 = vmatprep.subr.bf16.mxu1 %v1786_v14 }
 0x509   :  { %697 = vrot.lane.b32.xlu0 %v1862_v30, %s1794_s11 }
 0x50d   :  { %911 = vrot.lane.b32.xlu0 %v1945_v46, %s1790_s30 }
 0x57c   :  { %v531_v48 = vpop.xlane.xlu0 %530 }
 0x57d   :  { %1716 = vrcp.f32 %v531_v48 }
 0x580   :  { %v698_v51 = vpop.permute.xlu0 %697 }
 0x581   :  { %v703_v54 = vsel %vm213_vm3, %v698_v51, 0 }
 0x584   :  { %v912_v7 = vpop.permute.xlu0 %911 }
 0x585   :  { %v917_v8 = vsel %vm151_vm2, %v912_v7, 0 }
 0x58a   :  { %v1717_v49 = vpop.eup %1716 }
 0x5b4   :  { %v576_v30 = vpop.f32.mrf.mxu1 }
 0x5b5   :  { %v582_v50 = vmul.f32 %v1717_v49, %v576_v30 }
 0x5b6   :  { %v1578_v23 = vpop.f32.mrf.mxu1 }
 0x5b7   :  { %v583_v52 = vpack.c.bf16 %v582_v50, %v582_v50 }
 0x5b8   :  { %v579_v53 = vpop.f32.mrf.mxu1 }
 0x5b9   :  { %1583 = vmatmul.mubr.msk.bf16.vlgmr.msra.gmra.mxu0 %vm151_vm2, %v583_v52  ;;  %v2025_v53 = vld [vmem:[%s2085_s4] ss:$0 sm:$0xff]  ;;  %s1795_s4 = smov [#allocation5]  }
 0x5ba   :  { %1593 = vmatpush3.bf16.msra.mxu0 %v703_v54  ;;  %v1579_v55 = vpop.f32.mrf.mxu1  ;;  %1594 = vmatprep.mubr.msk.bf16.mxu0 %vm1787_vm1, %v1786_v14  ;;  %s1434_s19 = sshll.u32 %s1795_s4, 4  ;;  %s1435_s19 = int_to_ptr.vmem [resolvable:$true] %s1434_s19 }
 0x5bb   :  { %1604 = vmatprep.subr.bf16.mxu0 %v1786_v14  ;;  %s1758_s20 = scalar_lea.vmem %s1435_s19, 256  ;;  %p1763_p6 = scmp.lt.s32.totalorder %s1435_s19, %s1435_s19 }
 0x5bc   :  { %v680_v56 = vpop.f32.mrf.mxu1  ;;  %p1759_p5 = scmp.ne.s32.totalorder %s1435_s19, %s1758_s20  ;;  %p1764_p7 = scmp.lt.s32.totalorder %s1758_s20, %s1758_s20 }
 0x5bd   :  { %v686_v57 = vsel %vm198_vm4, %v680_v56, -inf }
 0x5be   :  { %687 = vmax.xlane.f32.xlu1 %v686_v57  ;;  %v1590_v58 = vpop.f32.mrf.mxu1  ;;  %p1765_p8 = por %p1764_p7, %p1763_p6 }
 0x5c0   :  { %v683_v61 = vpop.f32.mrf.mxu1  ;;  %p1766_p9 = pnand %p1765_p8, %p1759_p5 }
 0x5c2   :  { %v1591_v62 = vpop.f32.mrf.mxu1 }
 0x5cf   :  { %802 = vrot.lane.b32.xlu1 %v1945_v46, %s1789_s2 }
 0x5d3   :  { %909 = vrot.lane.b32.xlu1 %v1945_v46, %s1788_s0 }
 0x647   :  { %v688_v63 = vpop.xlane.xlu1 %687 }
 0x648   :  { %v689_v0 = vsub.f32 %v680_v56, %v688_v63 }
 0x64a   :  { %v690_v1 = vmul.f32 1.442695, %v689_v0 }
 0x64b   :  { %v803_v3 = vpop.permute.xlu1 %802 }
 0x64c   :  { %1718 = vpow2.f32 %v690_v1  ;;  %v808_v6 = vsel %vm151_vm2, %v803_v3, 0 }
 0x64f   :  { %v910_v9 = vpop.permute.xlu1 %909 }
 0x659   :  { %v1719_v2 = vpop.eup %1718 }
 0x65a   :  { %v692_v4 = vsel %vm198_vm4, %v1719_v2, 0.0  ;;  %v696_v5 = vpack.c.bf16 %v1719_v2, %v1719_v2 }
 0x65b   :  { %693 = vadd.xlane.f32.xlu0 %v692_v4 }
 0x65c   :  { %1595 = vmatmul.mubr.msk.bf16.vlgmr.msra.gmra.mxu0 %vm198_vm4, %v696_v5 }
 0x65d   :  { %1605 = vmatpush3.bf16.xpose.msra.mxu0 %v808_v6  ;;  %1606 = vmatprep.mubr.msk.bf16.mxu0 %vm1787_vm1, %v1786_v14 }
 0x65e   :  { %1616 = vmatprep.subr.bf16.mxu0 %v1786_v14 }
 0x664   :  { %1607 = vmatmul.mubr.msk.bf16.vlgmr.msra.gmra.mxu0 %vm151_vm2, %v1945_v46 }
 0x665   :  { %1617 = vmatpush3.bf16.xpose.msra.mxu0 %v917_v8  ;;  %1618 = vmatprep.mubr.msk.bf16.mxu0 %vm1787_vm1, %v1786_v14 }
 0x666   :  { %1628 = vmatprep.subr.bf16.mxu0 %v1786_v14 }
 0x66c   :  { %1619 = vmatmul.mubr.msk.bf16.vlgmr.msra.gmra.mxu0 %vm151_vm2, %v910_v9 }
 0x66d   :  { %1629 = vmatpush3.bf16.msra.mxu0 %v1899_v59  ;;  %1630 = vmatprep.mubr.msk.bf16.mxu0 %vm1787_vm1, %v1786_v14 }
 0x66e   :  { %1640 = vmatprep.subr.bf16.mxu0 %v1786_v14 }
 0x679   :  { %v629_v10 = vpop.f32.mrf.mxu0 }
 0x67a   :  { %v1984_v11 = vadd.f32 %v629_v10, %v1925_v22 }
 0x67b   :  { %v1584_v12 = vpop.f32.mrf.mxu0 }
 0x67d   :  { %v632_v13 = vpop.f32.mrf.mxu0 }
 0x67f   :  { %v1585_v15 = vpop.f32.mrf.mxu0 }
 0x6e4   :  { %v694_v59 = vpop.xlane.xlu0 %693 }
 0x6e5   :  { %1720 = vrcp.f32 %v694_v59 }
 0x6f2   :  { %v1721_v18 = vpop.eup %1720 }
 0x71c   :  { %v739_v19 = vpop.f32.mrf.mxu0 }
 0x71d   :  { %v745_v21 = vmul.f32 %v1721_v18, %v739_v19 }
 0x71e   :  { %v1596_v22 = vpop.f32.mrf.mxu0 }
 0x71f   :  { %v746_v24 = vpack.c.bf16 %v745_v21, %v745_v21 }
 0x720   :  { %v742_v26 = vpop.f32.mrf.mxu0 }
 0x721   :  { %1601 = vmatmul.mubr.msk.bf16.vlgmr.msra.gmra.mxu1 %vm151_vm2, %v746_v24 }
 0x722   :  { %1611 = vmatpush3.bf16.msra.mxu1 %v865_v27  ;;  %v1597_v28 = vpop.f32.mrf.mxu0  ;;  %1612 = vmatprep.mubr.msk.bf16.mxu1 %vm1787_vm1, %v1786_v14 }
 0x723   :  { %1622 = vmatprep.subr.bf16.mxu1 %v1786_v14 }
 0x724   :  { %v844_v25 = vpop.f32.mrf.mxu0 }
 0x725   :  { %v850_v36 = vsel %vm198_vm4, %v844_v25, -inf }
 0x726   :  { %851 = vmax.xlane.f32.xlu1 %v850_v36  ;;  %v1608_v29 = vpop.f32.mrf.mxu0 }
 0x728   :  { %v847_v31 = vpop.f32.mrf.mxu0 }
 0x72a   :  { %v1609_v32 = vpop.f32.mrf.mxu0 }
 0x72c   :  { %v953_v33 = vpop.f32.mrf.mxu0 }
 0x72d   :  { %v959_v34 = vsel %vm198_vm4, %v953_v33, -inf }
 0x72e   :  { %960 = vmax.xlane.f32.xlu0 %v959_v34  ;;  %v1620_v35 = vpop.f32.mrf.mxu0 }
 0x730   :  { %v956_v37 = vpop.f32.mrf.mxu0 }
 0x732   :  { %v1621_v38 = vpop.f32.mrf.mxu0 }
 0x744   :  { %971 = vrot.lane.b32.xlu0 %v1995_v20, %s1788_s0 }
 0x748   :  { %1107 = vrot.lane.b32.xlu0 %v1945_v46, %s1791_s6 }
 0x7af   :  { %v852_v39 = vpop.xlane.xlu1 %851 }
 0x7b0   :  { %v853_v40 = vsub.f32 %v844_v25, %v852_v39 }
 0x7b2   :  { %v854_v41 = vmul.f32 1.442695, %v853_v40 }
 0x7b4   :  { %1722 = vpow2.f32 %v854_v41 }
 0x7b7   :  { %v961_v42 = vpop.xlane.xlu0 %960 }
 0x7b8   :  { %v962_v43 = vsub.f32 %v953_v33, %v961_v42 }
 0x7ba   :  { %v963_v44 = vmul.f32 1.442695, %v962_v43 }
 0x7bb   :  { %v972_v48 = vpop.permute.xlu0 %971 }
 0x7bc   :  { %1724 = vpow2.f32 %v963_v44  ;;  %v977_v30 = vsel %vm213_vm3, %v972_v48, 0 }
 0x7bf   :  { %v1108_v12 = vpop.permute.xlu0 %1107 }
 0x7c1   :  { %v1723_v45 = vpop.eup %1722 }
 0x7c2   :  { %v860_v49 = vpack.c.bf16 %v1723_v45, %v1723_v45  ;;  %v856_v58 = vsel %vm198_vm4, %v1723_v45, 0.0 }
 0x7c4   :  { %1613 = vmatmul.mubr.msk.bf16.vlgmr.msra.gmra.mxu1 %vm198_vm4, %v860_v49 }
 0x7c5   :  { %1623 = vmatpush3.bf16.msra.mxu1 %v977_v30  ;;  %1624 = vmatprep.mubr.msk.bf16.mxu1 %vm1787_vm1, %v1786_v14 }
 0x7c6   :  { %1634 = vmatprep.subr.bf16.mxu1 %v1786_v14 }
 0x7c9   :  { %v1725_v50 = vpop.eup %1724 }
 0x7ca   :  { %v965_v51 = vsel %vm198_vm4, %v1725_v50, 0.0  ;;  %v969_v23 = vpack.c.bf16 %v1725_v50, %v1725_v50 }
 0x7cb   :  { %966 = vadd.xlane.f32.xlu1 %v965_v51 }
 0x7cc   :  { %1625 = vmatmul.mubr.msk.bf16.vlgmr.msra.gmra.mxu1 %vm198_vm4, %v969_v23 }
 0x7cd   :  { %1635 = vmatpush3.bf16.msra.mxu1 %v1910_v60  ;;  %1636 = vmatprep.mubr.msk.bf16.mxu1 %vm1787_vm1, %v1786_v14 }
 0x7ce   :  { %1646 = vmatprep.subr.bf16.mxu1 %v1786_v14 }
 0x7dc   :  { %1109 = vrot.lane.b32.xlu1 %v1945_v46, %s1792_s7 }
 0x7e1   :  { %v792_v52 = vpop.f32.mrf.mxu1 }
 0x7e2   :  { %v798_v54 = vadd.f32 %v792_v52, %v1984_v11 }
 0x7e3   :  { %v1602_v55 = vpop.f32.mrf.mxu1 }
 0x7e4   :  { %v1424_v60 = vadd.f32 %v2025_v53, %v798_v54 }
 0x7e5   :  { %v795_v56 = vpop.f32.mrf.mxu1 }
 0x7e6   :  { %1427 = vst.msk [vmem:[#allocation5] sm:$0xff] %vm1426_vm5, %v1424_v60 }
 0x7e7   :  { %v1603_v57 = vpop.f32.mrf.mxu1 }
 0x800   :  { %857 = vadd.xlane.f32.xlu1 %v856_v58 }
 0x811   :  { %1264 = vrot.lane.b32.xlu1 %v1945_v46, %s1793_s10 }
 0x815   :  { %1262 = vrot.lane.b32.xlu1 %v1945_v46, %s1794_s11 }
 0x854   :  { %v967_v61 = vpop.xlane.xlu1 %966 }
 0x855   :  { %1726 = vrcp.f32 %v967_v61 }
 0x858   :  { %v1110_v63 = vpop.permute.xlu1 %1109 }
 0x859   :  { %v1115_v10 = vsel %vm151_vm2, %v1110_v63, 0 }
 0x862   :  { %v1727_v4 = vpop.eup %1726 }
 0x884   :  { %v901_v62 = vpop.f32.mrf.mxu1 }
 0x886   :  { %v1614_v0 = vpop.f32.mrf.mxu1 }
 0x888   :  { %v904_v1 = vpop.f32.mrf.mxu1 }
 0x889   :  { %v858_v2 = vpop.xlane.xlu1 %857 }
 0x88a   :  { %1728 = vrcp.f32 %v858_v2  ;;  %v1615_v3 = vpop.f32.mrf.mxu1 }
 0x88c   :  { %v1013_v5 = vpop.f32.mrf.mxu1 }
 0x88d   :  { %v1019_v6 = vmul.f32 %v1727_v4, %v1013_v5  ;;  %v1265_v38 = vpop.permute.xlu1 %1264 }
 0x88e   :  { %v1626_v7 = vpop.f32.mrf.mxu1  ;;  %v1270_v41 = vsel %vm151_vm2, %v1265_v38, 0 }
 0x88f   :  { %v1020_v8 = vpack.c.bf16 %v1019_v6, %v1019_v6 }
 0x890   :  { %v1016_v9 = vpop.f32.mrf.mxu1 }
 0x891   :  { %1631 = vmatmul.mubr.msk.bf16.vlgmr.msra.gmra.mxu0 %vm151_vm2, %v1020_v8  ;;  %v1263_v42 = vpop.permute.xlu1 %1262 }
 0x892   :  { %1641 = vmatpush3.bf16.xpose.msra.mxu0 %v1115_v10  ;;  %v1627_v46 = vpop.f32.mrf.mxu1  ;;  %1642 = vmatprep.mubr.msk.bf16.mxu0 %vm1787_vm1, %v1786_v14 }
 0x893   :  { %1652 = vmatprep.subr.bf16.mxu0 %v1786_v14 }
 0x897   :  { %v1729_v11 = vpop.eup %1728 }
 0x898   :  { %v907_v13 = vmul.f32 %v1729_v11, %v901_v62 }
 0x899   :  { %1643 = vmatmul.mubr.msk.bf16.vlgmr.msra.gmra.mxu0 %vm151_vm2, %v1108_v12 }
 0x89a   :  { %v908_v15 = vpack.c.bf16 %v907_v13, %v907_v13  ;;  %1653 = vmatpush3.bf16.msra.mxu0 %v1952_v47  ;;  %1654 = vmatprep.mubr.msk.bf16.mxu0 %vm1787_vm1, %v1786_v14 }
 0x89b   :  { %1664 = vmatprep.subr.bf16.mxu0 %v1786_v14 }
 0x89c   :  { %1637 = vmatmul.mubr.msk.bf16.vlgmr.msra.gmra.mxu1 %vm151_vm2, %v908_v15 }
 0x89d   :  { %1648 = vmatprep.mubr.msk.bf16.mxu1 %vm1787_vm1, %v1786_v14 }
 0x951   :  { %v1058_v59 = vpop.f32.mrf.mxu0 }
 0x953   :  { %v1632_v17 = vpop.f32.mrf.mxu0 }
 0x955   :  { %v1061_v18 = vpop.f32.mrf.mxu0 }
 0x957   :  { %v1633_v19 = vpop.f32.mrf.mxu0 }
 0x959   :  { %v1151_v21 = vpop.f32.mrf.mxu0 }
 0x95a   :  { %v1157_v22 = vsel %vm198_vm4, %v1151_v21, -inf }
 0x95b   :  { %1158 = vmax.xlane.f32.xlu0 %v1157_v22  ;;  %v1644_v24 = vpop.f32.mrf.mxu0 }
 0x95c   :  { %v1101_v47 = vpop.f32.mrf.mxu1 }
 0x95d   :  { %v1102_v26 = vadd.f32 %v1101_v47, %v1058_v59  ;;  %v1154_v27 = vpop.f32.mrf.mxu0 }
 0x95e   :  { %v1638_v28 = vpop.f32.mrf.mxu1 }
 0x95f   :  { %v1645_v25 = vpop.f32.mrf.mxu0 }
 0x960   :  { %v1104_v36 = vpop.f32.mrf.mxu1 }
 0x962   :  { %v1639_v29 = vpop.f32.mrf.mxu1 }
 0x971   :  { %1168 = vrot.lane.b32.xlu0 %v1995_v20, %s1791_s6 }
 0x9e4   :  { %v1159_v31 = vpop.xlane.xlu0 %1158 }
 0x9e5   :  { %v1160_v32 = vsub.f32 %v1151_v21, %v1159_v31 }
 0x9e7   :  { %v1161_v33 = vmul.f32 1.442695, %v1160_v32 }
 0x9e8   :  { %v1169_v34 = vpop.permute.xlu0 %1168 }
 0x9e9   :  { %1730 = vpow2.f32 %v1161_v33  ;;  %v1174_v35 = vsel %vm213_vm3, %v1169_v34, 0 }
 0x9ea   :  { %1647 = vmatpush3.bf16.msra.mxu1 %v1174_v35 }
 0x9eb   :  { %1658 = vmatprep.subr.bf16.mxu1 %v1786_v14 }
 0x9f6   :  { %v1731_v37 = vpop.eup %1730 }
 0x9f7   :  { %v1163_v39 = vsel %vm198_vm4, %v1731_v37, 0.0  ;;  %v1167_v40 = vpack.c.bf16 %v1731_v37, %v1731_v37 }
 0x9f8   :  { %1164 = vadd.xlane.f32.xlu0 %v1163_v39 }
 0x9f9   :  { %1649 = vmatmul.mubr.msk.bf16.vlgmr.msra.gmra.mxu1 %vm198_vm4, %v1167_v40 }
 0x9fa   :  { %1659 = vmatpush3.bf16.xpose.msra.mxu1 %v1270_v41  ;;  %1660 = vmatprep.mubr.msk.bf16.mxu1 %vm1787_vm1, %v1786_v14 }
 0x9fb   :  { %1670 = vmatprep.subr.bf16.mxu1 %v1786_v14 }
 0xa01   :  { %1661 = vmatmul.mubr.msk.bf16.vlgmr.msra.gmra.mxu1 %vm151_vm2, %v1263_v42 }
 0xa02   :  { %1671 = vmatpush3.bf16.msra.mxu1 %v1989_v16  ;;  %1672 = vmatprep.mubr.msk.bf16.mxu1 %vm1787_vm1, %v1786_v14 }
 0xa0e   :  { %1323 = vrot.lane.b32.xlu0 %v1995_v20, %s1794_s11 }
 0xa81   :  { %v1165_v43 = vpop.xlane.xlu0 %1164 }
 0xa82   :  { %1732 = vrcp.f32 %v1165_v43 }
 0xa85   :  { %v1324_v49 = vpop.permute.xlu0 %1323 }
 0xa86   :  { %v1329_v23 = vsel %vm213_vm3, %v1324_v49, 0 }
 0xa8f   :  { %v1733_v44 = vpop.eup %1732 }
 0xab9   :  { %v1210_v45 = vpop.f32.mrf.mxu1 }
 0xaba   :  { %v1216_v48 = vmul.f32 %v1733_v44, %v1210_v45 }
 0xabb   :  { %v1650_v30 = vpop.f32.mrf.mxu1 }
 0xabc   :  { %v1217_v50 = vpack.c.bf16 %v1216_v48, %v1216_v48 }
 0xabd   :  { %v1213_v51 = vpop.f32.mrf.mxu1 }
 0xabe   :  { %1655 = vmatmul.mubr.msk.bf16.vlgmr.msra.gmra.mxu0 %vm151_vm2, %v1217_v50 }
 0xabf   :  { %1665 = vmatpush3.bf16.msra.mxu0 %v1329_v23  ;;  %v1651_v16 = vpop.f32.mrf.mxu1  ;;  %1666 = vmatprep.mubr.msk.bf16.mxu0 %vm1787_vm1, %v1786_v14 }
 0xac1   :  { %v1306_v52 = vpop.f32.mrf.mxu1 }
 0xac2   :  { %v1312_v20 = vsel %vm198_vm4, %v1306_v52, -inf }
 0xac3   :  { %1313 = vmax.xlane.f32.xlu1 %v1312_v20  ;;  %v1662_v54 = vpop.f32.mrf.mxu1 }
 0xac5   :  { %v1309_v55 = vpop.f32.mrf.mxu1 }
 0xac7   :  { %v1663_v60 = vpop.f32.mrf.mxu1 }
 0xb4c   :  { %v1314_v56 = vpop.xlane.xlu1 %1313 }
 0xb4d   :  { %v1315_v57 = vsub.f32 %v1306_v52, %v1314_v56 }
 0xb4f   :  { %v1316_v58 = vmul.f32 1.442695, %v1315_v57 }
 0xb51   :  { %1734 = vpow2.f32 %v1316_v58 }
 0xb5e   :  { %v1735_v61 = vpop.eup %1734 }
 0xb5f   :  { %v1318_v62 = vsel %vm198_vm4, %v1735_v61, 0.0  ;;  %v1322_v63 = vpack.c.bf16 %v1735_v61, %v1735_v61 }
 0xb60   :  { %1319 = vadd.xlane.f32.xlu1 %v1318_v62 }
 0xb61   :  { %1667 = vmatmul.mubr.msk.bf16.vlgmr.msra.gmra.mxu0 %vm198_vm4, %v1322_v63 }
 0xb7e   :  { %v1255_v0 = vpop.f32.mrf.mxu0 }
 0xb7f   :  { %v1261_v14 = vadd.f32 %v1255_v0, %v1102_v26 }
 0xb80   :  { %v1656_v1 = vpop.f32.mrf.mxu0 }
 0xb82   :  { %v1258_v2 = vpop.f32.mrf.mxu0 }
 0xb84   :  { %v1657_v3 = vpop.f32.mrf.mxu0 }
 0xbe9   :  { %v1320_v4 = vpop.xlane.xlu1 %1319 }
 0xbea   :  { %1736 = vrcp.f32 %v1320_v4 }
 0xbf7   :  { %v1737_v5 = vpop.eup %1736 }
 0xc21   :  { %v1365_v6 = vpop.f32.mrf.mxu0 }
 0xc22   :  { %v1371_v7 = vmul.f32 %v1737_v5, %v1365_v6 }
 0xc23   :  { %v1668_v8 = vpop.f32.mrf.mxu0 }
 0xc24   :  { %v1372_v9 = vpack.c.bf16 %v1371_v7, %v1371_v7 }
 0xc25   :  { %v1368_v10 = vpop.f32.mrf.mxu0 }
 0xc26   :  { %1673 = vmatmul.mubr.msk.bf16.vlgmr.msra.gmra.mxu1 %vm151_vm2, %v1372_v9 }
 0xc27   :  { %v1669_v46 = vpop.f32.mrf.mxu0 }
 0xce6   :  { %v1410_v11 = vpop.f32.mrf.mxu1 }
 0xce7   :  { %v1416_v12 = vadd.f32 %v1410_v11, %v1261_v14 }
 0xce8   :  { %v1674_v13 = vpop.f32.mrf.mxu1 }
 0xce9   :  { %v1425_v15 = vadd.f32 %v2025_v53, %v1416_v12 }
 0xcea   :  { %v1413_v59 = vpop.f32.mrf.mxu1 }
 0xceb   :  { %1428 = vst.msk [vmem:[#allocation5 + $0x8] sm:$0xff] %vm1426_vm5, %v1425_v15 }
 0xcec   :  { %v1675_v17 = vpop.f32.mrf.mxu1 }
 0xced   :  { %1769 = shalt.err (!%p1766_p9)
}
 0xcee   :  { %1440 = dma.vmem_to_hbm [thread:$0]  %s1435_s19, 256, %s2086_s5, [#allocation4], %s1783_s21, %s1783_s21, %s1784_s22  }
 0xcef   :  { %1780 = dma.done.wait [#allocation4], 256  }
 0xcf0   :  { %1781 = vsyncadd [#allocation4], 4294967040 }
 0xcf1   :  { %1444 = vsyncpa [#allocation3], 1 }
 0xcf2   :  { %1445 = vsyncpa [#allocation4], 1 }

</bundles_post_ra>
